<compile_context>
chip_gen: v5e
topology: v5e:2x2
jax: 0.10.0
libtpu: 0.0.40
codegen_flags: <defaults>
</compile_context>

<pallas_src>
import jax
import jax.numpy as jnp
from jax.experimental import pallas as pl
from jax.experimental.pallas import tpu as pltpu


def _patch_embed_kernel(x_ref, w_ref, posb_ref, o_ref):
    # x_ref:    (tile_m, K)  bf16  flattened patches (tile_m = nb * P rows, streamed)
    # w_ref:    (K, E)       bf16  flattened conv weight            (resident)
    # posb_ref: (tile_m, E)  bf16/f32  pos_embedding + conv bias    (resident)
    # o_ref:    (tile_m, E)  out dtype (bf16 by default)
    proj = jnp.dot(x_ref[...], w_ref[...], preferred_element_type=jnp.float32)
    # f32 epilogue add in-register; cast only at the store.
    o_ref[...] = (proj + posb_ref[...].astype(jnp.float32)).astype(o_ref.dtype)


def _choose_images_per_tile(B, P, target_rows=1536, max_rows=2048):
    """Pick nb = images per M-tile such that:
       - nb divides B (every tile starts on an image boundary -> posb aligns),
       - tile_m = nb*P is sublane-aligned (multiple of 8),
       - the grid B//nb is even and >= 2 when possible (v7x: 2 TensorCores),
       - tile_m is close to target_rows and preferably <= max_rows (VMEM).
    Returns None if no image-boundary tile is sublane-aligned."""
    cands = [nb for nb in range(1, B + 1)
             if B % nb == 0 and (nb * P) % 8 == 0]
    if not cands:
        return None

    def score(nb):
        steps = B // nb
        rows = nb * P
        even_multi_step = (steps >= 2 and steps % 2 == 0)
        return (0 if even_multi_step else 1,      # prefer even grid >= 2 (v7x)
                0 if rows <= max_rows else 1,     # prefer fitting the VMEM cap
                abs(target_rows - rows))          # prefer close to target rows
    return min(cands, key=score)


def patch_embed(x, conv_w, conv_b, pos_emb, img_size, patch_size, embed_dim,
                out_dtype=jnp.bfloat16):
    """x: (B, C, H, W) NCHW float32.  Returns (B, P, E) in out_dtype."""
    B, C, H, W = x.shape
    ph, pw = patch_size
    assert H == img_size[0] and W == img_size[1], "input size mismatch"
    assert H % ph == 0 and W % pw == 0, "bad img/patch dim combo"
    Px, Py = H // ph, W // pw
    P = Px * Py
    K = C * ph * pw
    E = embed_dim
    M = B * P

    # --- wrapper glue: bf16 cast FIRST, then im2col (half-size HBM copy) ----
    # (B, C, Px, ph, Py, pw) -> (B, Px, Py, C, ph, pw) -> (B*P, K)
    xb = x.astype(jnp.bfloat16)
    patches = xb.reshape(B, C, Px, ph, Py, pw)
    patches = jnp.transpose(patches, (0, 2, 4, 1, 3, 5))
    patches = patches.reshape(M, K)

    # Conv2d weight (E, C, ph, pw) -> (K, E), bf16.  No K / E padding.
    w_mat = jnp.transpose(conv_w.reshape(E, K), (1, 0)).astype(jnp.bfloat16)

    # Fold conv bias into the positional embedding once (per-patch-row epilogue).
    posb = (pos_emb.reshape(P, E).astype(jnp.float32)
            + conv_b.astype(jnp.float32)[None, :])
    posb_dtype = jnp.bfloat16 if out_dtype == jnp.bfloat16 else jnp.float32

    # --- M tiling: nb whole images per grid step ----------------------------
    nb = _choose_images_per_tile(B, P)
    if nb is None:
        # No image-boundary tile is sublane-aligned (e.g. odd P and odd B):
        # fall back to one full-M block (block dim == array dim is always
        # legal).  Single-step grid: no pipelining / dual-TC use — rare path.
        nb = B
    tile_m = nb * P
    grid = (M // tile_m,)
    # Guard the silent assumption the positional add relies on: every M-tile
    # starts on an image boundary and tiles the flattened rows exactly.
    assert tile_m % P == 0 and M % tile_m == 0, "tiles must align to images"

    # Resident epilogue operand for one tile (nb images), in bf16 when the
    # output is bf16 so it does not scale the VMEM budget in f32.
    posb_tile = jnp.tile(posb, (nb, 1)).astype(posb_dtype)   # (tile_m, E)

    out = pl.pallas_call(
        _patch_embed_kernel,
        out_shape=jax.ShapeDtypeStruct((M, E), out_dtype),
        grid_spec=pltpu.PrefetchScalarGridSpec(
            num_scalar_prefetch=0,
            grid=grid,
            in_specs=[
                pl.BlockSpec((tile_m, K), lambda i: (i, 0)),   # patches (streamed)
                pl.BlockSpec((K, E), lambda i: (0, 0)),        # weight (resident)
                pl.BlockSpec((tile_m, E), lambda i: (0, 0)),   # pos+bias (resident)
            ],
            out_specs=pl.BlockSpec((tile_m, E), lambda i: (i, 0)),
        ),
        compiler_params=pltpu.CompilerParams(
            dimension_semantics=("parallel",),
            # v5e default scoped VMEM is 16 MiB -> raise; stays within the
            # review's 40-48 MiB budget for v7x's 64 MiB physical VMEM.
            vmem_limit_bytes=48 * 1024 * 1024,
        ),
    )(patches, w_mat, posb_tile)

    # (M, E) -> (B, P, E) is a row-major-compatible (free) reshape; no padded
    # lanes to slice away, so no extra pass over the output.
    return out.reshape(B, P, E)


if __name__ == "__main__":
    # Small shapes consistent with the module.
    img_size = (16, 16)
    patch_size = (4, 4)
    in_chans = 4
    embed_dim = 32
    B = 2

    Px = img_size[0] // patch_size[0]
    Py = img_size[1] // patch_size[1]
    P = Px * Py
    K = in_chans * patch_size[0] * patch_size[1]

    key = jax.random.PRNGKey(0)
    k_x, k_w, k_b, k_pos = jax.random.split(key, 4)

    x = jax.random.normal(k_x, (B, in_chans, *img_size), dtype=jnp.float32)
    conv_w = jax.random.normal(
        k_w, (embed_dim, in_chans, *patch_size), dtype=jnp.float32) * 0.05
    conv_b = jax.random.normal(k_b, (embed_dim,), dtype=jnp.float32) * 0.05
    # nn.Parameter(torch.zeros(1, P, E)) -- keep shape, small random init to
    # exercise the positional-add path deterministically.
    pos_emb = jax.random.normal(k_pos, (1, P, embed_dim), dtype=jnp.float32) * 0.02

    out = patch_embed(x, conv_w, conv_b, pos_emb, img_size, patch_size, embed_dim)
    out = jax.block_until_ready(out)

    # Reference with matched numerics: bf16 matmul operands, f32 accumulate,
    # f32 bias + positional-embedding epilogue (kernel then stores bf16).
    patches_ref = jnp.transpose(
        x.reshape(B, in_chans, Px, patch_size[0], Py, patch_size[1]),
        (0, 2, 4, 1, 3, 5)).reshape(B, P, K).astype(jnp.bfloat16)
    w_ref = jnp.transpose(conv_w.reshape(embed_dim, K), (1, 0)).astype(jnp.bfloat16)
    ref = (jnp.einsum("bpk,ke->bpe", patches_ref, w_ref,
                      preferred_element_type=jnp.float32)
           + conv_b[None, None, :] + pos_emb)

    assert out.shape == (B, P, embed_dim)
    assert out.dtype == jnp.bfloat16
    out_f32 = out.astype(jnp.float32)
    err = float(jnp.max(jnp.abs(out_f32 - ref)))
    assert jnp.allclose(out_f32, ref, atol=2e-2, rtol=2e-2), err

    print("KERNEL_OK")
</pallas_src>

<mosaic_0001>
module attributes {stable_mosaic.version = 11 : i64} {
  func.func @_patch_embed_kernel(%arg0: i32, %arg1: memref<16x64xbf16, #tpu.memory_space<vmem>>, %arg2: memref<64x32xbf16, #tpu.memory_space<vmem>>, %arg3: memref<16x32xbf16, #tpu.memory_space<vmem>>, %arg4: memref<16x32xbf16, #tpu.memory_space<vmem>>) attributes {dimension_semantics = [#tpu.dimension_semantics<parallel>], iteration_bounds = array<i64: 2>, scalar_prefetch = 0 : i64, scratch_operands = 0 : i64, tpu.core_type = #tpu.core_type<tc>, window_params = [{transform_indices = @transform_0, window_bounds = array<i64: 16, 64>}, {pipeline_mode = #tpu.pipeline_mode<synchronous>, transform_indices = @transform_1, window_bounds = array<i64: 64, 32>}, {pipeline_mode = #tpu.pipeline_mode<synchronous>, transform_indices = @transform_2, window_bounds = array<i64: 16, 32>}, {transform_indices = @transform_3, window_bounds = array<i64: 16, 32>}]} {
    %c0 = arith.constant 0 : index
    %c0_0 = arith.constant 0 : index
    %0 = vector.load %arg1[%c0, %c0_0] : memref<16x64xbf16, #tpu.memory_space<vmem>>, vector<16x64xbf16>
    %c0_1 = arith.constant 0 : index
    %c0_2 = arith.constant 0 : index
    %1 = vector.load %arg2[%c0_1, %c0_2] : memref<64x32xbf16, #tpu.memory_space<vmem>>, vector<64x32xbf16>
    %cst = arith.constant dense<0.000000e+00> : vector<16x32xf32>
    %2 = tpu.matmul %0, %1, %cst {dimension_numbers = #tpu.dot_dimension_numbers<[1], [0], [0], [1], [0, 0, 1, 1], [], []>} : vector<16x64xbf16>, vector<64x32xbf16>, vector<16x32xf32> -> vector<16x32xf32>
    %c0_3 = arith.constant 0 : index
    %c0_4 = arith.constant 0 : index
    %3 = vector.load %arg3[%c0_3, %c0_4] : memref<16x32xbf16, #tpu.memory_space<vmem>>, vector<16x32xbf16>
    %4 = arith.extf %3 : vector<16x32xbf16> to vector<16x32xf32>
    %5 = arith.addf %2, %4 : vector<16x32xf32>
    %6 = arith.truncf %5 : vector<16x32xf32> to vector<16x32xbf16>
    %c0_5 = arith.constant 0 : index
    %c0_6 = arith.constant 0 : index
    %7 = vector.load %arg4[%c0_5, %c0_6] : memref<16x32xbf16, #tpu.memory_space<vmem>>, vector<16x32xbf16>
    tpu.vector_store %arg4[%c0_5, %c0_6], %6 {strides = array<i32>} : memref<16x32xbf16, #tpu.memory_space<vmem>>, vector<16x32xbf16>,
    return
  }
  func.func @transform_0(%arg0: i32) -> (i32, i32) {
    %c0_i32 = arith.constant 0 : i32
    %c0_i32_0 = arith.constant 0 : i32
    return %arg0, %c0_i32 : i32, i32
  }
  func.func @transform_1(%arg0: i32) -> (i32, i32) {
    %c0_i32 = arith.constant 0 : i32
    %c0_i32_0 = arith.constant 0 : i32
    %c0_i32_1 = arith.constant 0 : i32
    return %c0_i32, %c0_i32_0 : i32, i32
  }
  func.func @transform_2(%arg0: i32) -> (i32, i32) {
    %c0_i32 = arith.constant 0 : i32
    %c0_i32_0 = arith.constant 0 : i32
    %c0_i32_1 = arith.constant 0 : i32
    return %c0_i32, %c0_i32_0 : i32, i32
  }
  func.func @transform_3(%arg0: i32) -> (i32, i32) {
    %c0_i32 = arith.constant 0 : i32
    %c0_i32_0 = arith.constant 0 : i32
    return %arg0, %c0_i32 : i32, i32
  }
}

</mosaic_0001>

<bundles_post_ra>
// kernel: tpu_custom_call.1
= control target key start
LH: loop header
LB: loop body
LE: loop exit
PB: predicated region body
PF: predicated region fallthrough
CT: control target
= control target key end

     0   :  { %8 = vsyncpa [#allocation3], 0  ;;  %s586_s0 = inlined_call_operand.vmem [shape: bf16[32,64], index: 0, kind: input, shape index: {}]   ;;  %s587_s1 = inlined_call_operand.vmem [shape: bf16[64,32], index: 1, kind: input, shape index: {}]   ;;  %s588_s2 = inlined_call_operand.vmem [shape: bf16[16,32], index: 2, kind: input, shape index: {}]   ;;  %s589_s3 = inlined_call_operand.hbm [shape: bf16[32,32], index: 3, kind: output, shape index: {}]  }
   0x1   :  { %10 = vsyncpa [#allocation3 + $0x1], 0  ;;  %s487_s12 = smov 0   ;;  %s489_s13 = smov 0  }
   0x2   :  { %s491_s14 = smov 0   ;;  %s493_s15 = smov 0  }
   0x3 LB: > { %s508_s16 = sadd.s32 4294967295, %s463_s15   ;;  %s317_s17 = sadd.s32 4294967294, %s463_s15   ;;  %s463_s15 = sphi %s493_s15, %s595_s15   ;;  %s459_s14 = sphi %s491_s14, %s594_s14   ;;  %s455_s13 = sphi %s489_s13, %s593_s13   ;;  %s451_s12 = sphi %s487_s12, %s592_s12  }
   0x4   : > { %s512_s18 = sadd.s32 1, %s463_s15   ;;  %s91_s19 = sadd.s32 1, %s459_s14 }
   0x5   : > { %s88_s20 = ssub.s32 %s463_s15, %s512_s18  ;;  %p101_p0 = scmp.ne.s32.totalorder %s459_s14, %s455_s13 }
   0x6   : > { %p89_p1 = scmp.eq.s32.totalorder %s88_s20, 0  ;;  %p102_p2 = scmp.eq.s32.totalorder %s508_s16, 1 }
   0x7   : > { %p107_p3 = scmp.ne.s32.totalorder %s455_s13, %s451_s12  ;;  %p108_p4 = scmp.eq.s32.totalorder %s317_s17, 1 }
   0x8   : > { %s523_s21 = scalar_select %p89_p1, %s459_s14, %s91_s19  }
   0x9   : > { %p525_p5 = por %p102_p2, %p101_p0  ;;  %p529_p6 = por %p108_p4, %p107_p3 }
   0xa   : > { %p320_p7 = scmp.ge.s32.totalorder %s463_s15, 1  ;;  %p141_p8 = scmp.lt.s32.totalorder %s463_s15, 3 }
   0xc   : > { %p142_p9 = pnand %p320_p7, %p141_p8 }
   0xd   : > { %s322_s26 = sshll.u32 (!%p142_p9), %s508_s16, 1  ;;  %s162_s17 = sand.u32 (!%p142_p9), 1, %s455_s13  }
   0xe   : > { %145 = sbr.rel (%p142_p9) target bundleno = 177 (0xb1), region = 32  ;;  %p166_p10 = scmp.lt.s32.totalorder (!%p142_p9), %s322_s26, 3 }
   0xf   : > { %s321_s19 = sshll.u32 (!%p142_p9), %s162_s17, 3  ;;  %s355_s20 = sshll.u32 (!%p142_p9), %s508_s16, 3 }
  0x10   : > { %s164_s27 = scalar_lea.vmem (!%p142_p9), [#allocation2], %s321_s19  ;;  %s240_s30 = scalar_lea.sflag (!%p142_p9), [#allocation3], %s162_s17 }
  0x11   : > { %s252_s28 = sshll.u32 (!%p142_p9), %s164_s27, 4  ;;  %s421_s7 = scalar_lea.hbm (!%p142_p9), %s589_s3, 16  ;;  %s253_s28 = int_to_ptr.vmem [resolvable:$true] %s252_s28 }
  0x13   : > { %v354_v0 = vld [vmem:[%s587_s1 + $0x18] sm:$0xff]  ;;  %v353_v1 = vld [vmem:[%s587_s1 + $0x10] sm:$0xff]  ;;  %s597_s26 = smov (!%p166_p10, %s322_s26), 3  ;;  %v352_v2 = vld [vmem:[%s587_s1 + $0x8] sm:$0xff]  ;;  %vm216_vm0 = vcmask 523264   ;;  %vm236_vm1 = vcmask 257024  }
  0x14   : > { %224 = vmatpush.bf16.msra.mxu0 %v354_v0  ;;  %s323_s4 = sshll.u32 %s597_s26, 2  ;;  %v351_v3 = vld [vmem:[%s587_s1] sm:$0xff]  ;;  %s251_s26 = scalar_lea.hbm %s589_s3, %s355_s20 }
  0x15   : > { %s169_s9 = scalar_lea.vmem %s586_s0, %s323_s4  ;;  %v357_v5 = vld [vmem:[%s588_s2] sm:$0xff]   ;;  %s254_s29 = sshll.u32 %s251_s26, 4  ;;  %s255_s29 = int_to_ptr.hbm [resolvable:$true] %s254_s29 }
  0x16   : > { %v350_v4 = vld [vmem:[%s169_s9] sm:$0xff]  ;;  %v358_v6 = vunpack.c.l.bf16 %v357_v5  ;;  %v359_v10 = vunpack.c.h.bf16 %v357_v5  ;;  %s415_s16 = sshra.s32 %s255_s29, 4  ;;  %s416_s16 = int_to_ptr.hbm [resolvable:$true] %s415_s16 }
  0x17   : > { %s417_s4 = scalar_lea.hbm %s416_s16, 8  ;;  %p422_p0 = scmp.lt.s32.totalorder %s416_s16, %s589_s3 }
  0x18   : > { %225 = vmatpush.bf16.msra.mxu0 %v353_v1  ;;  %p418_p11 = scmp.ne.s32.totalorder %s416_s16, %s417_s4  ;;  %p423_p1 = scmp.lt.s32.totalorder %s421_s7, %s417_s4 }
  0x1a   : > { %p419_p12 = pnand %p418_p11, %p525_p5  ;;  %p424_p2 = por %p423_p1, %p422_p0 }
  0x1c   : > { %226 = vmatpush.bf16.msra.mxu0 %v352_v2  ;;  %p420_p13 = pneg %p419_p12 }
  0x1e   : > { %p425_p3 = pnand %p424_p2, %p420_p13 }
  0x20   : > { %227 = vmatpush.bf16.msra.mxu0 %v351_v3 }
  0x23   : > { %344 = vmatmul.msk.bf16.vlgmr.msra.gmra.mxu0 %vm216_vm0, %v350_v4 }
  0xa0   : > { %v229_v7 = vpop.f32.mrf.mxu0 }
  0xa1   : > { %v230_v8 = vadd.f32 %v358_v6, %v229_v7 }
  0xa3   : > { %v234_v9 = vpack.c.bf16 %v230_v8, %v230_v8 }
  0xa5   : > { %237 = vst.msk [vmem:[%s164_s27] sm:$0xf] %vm236_vm1, %v234_v9 }
  0xa8   : > { %v231_v11 = vpop.f32.mrf.mxu0 }
  0xa9   : > { %v232_v12 = vadd.f32 %v359_v10, %v231_v11 }
  0xab   : > { %v235_v13 = vpack.c.bf16 %v232_v12, %v232_v12 }
  0xad   : > { %238 = vst.msk [vmem:[%s164_s27 + $0x4] sm:$0xf] %vm236_vm1, %v235_v13 }
  0xae   : > { %428 = shalt.err (!%p425_p3)
}
  0xaf   : > { %s465_s10 = smov 64   ;;  %s466_s11 = smov 4  }
  0xb0   : > { %360 = dma.vmem_to_hbm [thread:$0]  (%p525_p5), %s253_s28, 128, %s255_s29, %s240_s30, %s465_s10, %s465_s10, %s466_s11  }
  0xb1 PF: > { %p366_p4 = scmp.ge.s32.totalorder %s463_s15, 2  ;;  %s269_s17 = sand.u32 1, %s451_s12  }
  0xb2   : > { %s270_s19 = scalar_lea.sflag [#allocation3], %s269_s17 }
  0xb3   : > { %p363_p7 = pnand %p366_p4, %p529_p6 }
  0xb5   : > { %p364_p8 = pneg %p363_p7 }
  0xb7   : > { %446 = dma.done.wait (%p364_p8), %s270_s19, 128  }
  0xb8   : > { %448 = vsyncadd (%p364_p8), %s270_s19, 4294967168  ;;  %p13_p9 = scmp.ge.s32.totalorder %s512_s18, 4   ;;  %s592_s12 = smov %s455_s13 }
  0xb9   : > { %s593_s13 = smov %s459_s14  ;;  %s594_s14 = smov %s523_s21 }
  0xba   : > { %s595_s15 = smov %s512_s18  ;;  %15 = sbr.rel (!%p13_p9) target bundleno = 3 (0x3), region = 67 }
  0xbf   :  { %276 = vsyncpa [#allocation3], 1 }
  0xc0   :  { %278 = vsyncpa [#allocation3 + $0x1], 1 }

</bundles_post_ra>
